<compile_context>
chip_gen: v5e
topology: v5e:2x2
jax: 0.10.0
libtpu: 0.0.40
codegen_flags: <defaults>
</compile_context>

<pallas_src>
import functools

import numpy as np
import jax
import jax.numpy as jnp
from jax.experimental import pallas as pl
from jax.experimental.pallas import tpu as pltpu


# Cast the 1x1-conv matmul operands to bf16 (keeping f32 accumulation) only once the
# contraction dim is large enough for MXU throughput to matter.  NOTE: this changes
# numerics vs. the f32 PyTorch conv; the toy channel counts below never hit this branch.
_BF16_MIN_CIN = 64

# Largest flattened lane extent for which a single dense decimation selector is used;
# beyond this the selector is applied block-diagonally (period 2*W).
_DENSE_SEL_MAX = 1024


# ---------------------------------------------------------------------------
# pltpu.roll direction probe (lane-rotate convention differs from jnp.roll on some
# toolchains; resolve it once instead of assuming).
# ---------------------------------------------------------------------------
_ROLL_SIGN = None


def _roll_sign():
    """+1 if pltpu.roll(x, +1, axis) moves content toward higher indices (jnp.roll
    convention), -1 if it moves content toward lower indices."""
    global _ROLL_SIGN
    if _ROLL_SIGN is None:
        def probe(x_ref, o_ref):
            o_ref[...] = pltpu.roll(x_ref[...], 1, axis=1)

        x = jnp.broadcast_to(jnp.arange(128, dtype=jnp.float32), (8, 128))
        y = pl.pallas_call(
            probe, out_shape=jax.ShapeDtypeStruct((8, 128), jnp.float32))(x)
        _ROLL_SIGN = 1 if float(y[0, 0]) == 127.0 else -1
    return _ROLL_SIGN


def _neighbor(x, k, sign):
    """y[..., i] = x[..., (i + k) % P]  (lane rotate on the XLU).  Wrap-around only ever
    lands on lanes the decimation never selects, so it is harmless."""
    p = x.shape[-1]
    return pltpu.roll(x, (-sign * k) % p, axis=x.ndim - 1)


# ---------------------------------------------------------------------------
# 2x2 decimation (keep the (h even, w even) lanes) via 0/1 selector matmuls on the MXU.
# ---------------------------------------------------------------------------
def _pool_selector(block, w, dtype):
    """(block, block // 4) 0/1 matrix.  Lanes are flattened (..., h, w) with row length
    `w` (block must be a multiple of 2*w); output column k = (m, w2) selects input lane
    (2*m, 2*w2), i.e. the top-left corner of each 2x2 window."""
    w2 = w // 2
    rows = jax.lax.broadcasted_iota(jnp.int32, (block, block // 4), 0)
    cols = jax.lax.broadcasted_iota(jnp.int32, (block, block // 4), 1)
    src = 2 * (cols // w2) * w + 2 * (cols % w2)
    return (rows == src).astype(dtype)


def _decimate(x, w):
    """Keep the (h even, w even) lanes of x (rows = channels, lanes = (n, h, w)).
    # TODO(synk): 0*x products turn +-inf inputs into NaN; true MaxPool2d would keep them.
    # TODO(synk): for W >= ~1024 chunk below the 2*W period so the selector stays tiny.
    """
    _, p = x.shape
    dtype = x.dtype
    if p <= _DENSE_SEL_MAX:
        sel = _pool_selector(p, w, dtype)
        return jnp.dot(x, sel, preferred_element_type=jnp.float32).astype(dtype)
    # Block-diagonal application: chunks are whole 2*w periods (lane-tile friendly where
    # possible), so MXU cost stays linear in W and the selector stays a few vregs.
    chunk = 2 * w
    while chunk < 512 and p % (2 * chunk) == 0:
        chunk *= 2
    sel = _pool_selector(chunk, w, dtype)
    pieces = [
        jnp.dot(x[:, i * chunk:(i + 1) * chunk], sel,
                preferred_element_type=jnp.float32).astype(dtype)
        for i in range(p // chunk)
    ]
    return jnp.concatenate(pieces, axis=-1)


# ---------------------------------------------------------------------------
# Kernel: all stages fused, one (batch-tile, row-tile) block per grid step.
# ---------------------------------------------------------------------------
def _downsample_kernel(x_ref, *refs, w0, roll_sign):
    """x_ref : (Nb, C0, Ht*W0)  lane-dense NC(HW) input block
    refs  : (w_0, ..., w_{S-1}, o_ref); w_s : (Cout_s, Cin_s) PyTorch layout,
            o_ref : (Nb, Cout_S, (Ht//2^S)*(W0//2^S)) lane-dense output block."""
    w_refs, o_ref = refs[:-1], refs[-1]
    nb = x_ref.shape[0]

    # Working layout: rows = channels, lanes = (image, h, w).  Per-image slabs arrive
    # lane-dense from the DMA and are simply lane-concatenated (nb > 1 only for tiny
    # spatial blocks), so no sublane->lane relayout is needed to batch images into lanes.
    if nb == 1:
        cur = x_ref[0]
    else:
        cur = jnp.concatenate([x_ref[n] for n in range(nb)], axis=-1)

    w = w0
    for w_ref in w_refs:
        wt = w_ref[...]                                         # (Cout, Cin), PyTorch layout
        # ---- MaxPool2d(2, 2): neighbour maxes (XLU roll + VPU max), then keep the
        #      (h even, w even) lanes with a single selector matmul (MXU). ----
        half = jnp.maximum(cur, _neighbor(cur, 1, roll_sign))   # pair along w
        hmax = jnp.maximum(half, _neighbor(half, w, roll_sign)) # pair along h
        pooled = _decimate(hmax, w)                             # (Cin, lanes/4)
        # ---- Conv2d(Cin, 2*Cin, 1, bias=False): (Cout, Cin) @ (Cin, pixels); all the
        #      block's pixels live on the lane dim, so the matmul is lane-dense. ----
        if wt.shape[1] >= _BF16_MIN_CIN and pooled.dtype == jnp.float32:
            z = jnp.dot(wt.astype(jnp.bfloat16), pooled.astype(jnp.bfloat16),
                        preferred_element_type=jnp.float32)
        else:
            z = jnp.dot(wt, pooled, preferred_element_type=jnp.float32)
        cur = z.astype(x_ref.dtype)
        w //= 2

    # Lane-dense store; each image's slab is a contiguous lane range of `cur`.
    hw_out = cur.shape[-1] // nb
    if nb == 1:
        o_ref[0] = cur.astype(o_ref.dtype)
    else:
        for n in range(nb):
            o_ref[n] = cur[:, n * hw_out:(n + 1) * hw_out].astype(o_ref.dtype)


# ---------------------------------------------------------------------------
# Wrapper: generation-aware tiling + pallas_call.
# ---------------------------------------------------------------------------
def _vmem_limit_bytes():
    """Scoped-VMEM limit from the detected chip (v7x: 64 MiB/TC, v5e/v6e: 128 MiB)."""
    try:
        phys = int(pltpu.get_tpu_info().vmem_capacity_bytes)
    except Exception:                    # info unavailable -> conservative (v7x) default
        phys = 64 * 1024 * 1024
    return min(phys * 3 // 4, 100 * 1024 * 1024)


def _choose_tiles(N, C, H, W, n_stages, itemsize, vmem_limit, batch_tile, row_tile):
    factor = 2 ** n_stages
    # Budget for one input block: leaves room for double-buffered in/out blocks plus the
    # per-stage f32 intermediates (~4-6x one input block).
    target = max(vmem_limit // 8, 1 << 20)

    if row_tile is None:
        valid = [ht for ht in range(factor, H + 1, factor)
                 if H % ht == 0
                 and (ht == H or (ht * W) % (128 * factor * factor) == 0)]
        fitting = [ht for ht in valid if C * ht * W * itemsize <= target]
        row_tile = max(fitting) if fitting else min(valid)
    else:
        if (H % row_tile or row_tile % factor
                or (row_tile != H and (row_tile * W) % (128 * factor * factor))):
            raise ValueError(f"invalid row_tile={row_tile} for H={H}, W={W}, scale={factor}")

    if batch_tile is None:
        # Grow the image tile (powers of two dividing N) only while even the last
        # stage's matmul RHS would be lane-starved (<128 lanes) and the block still fits.
        batch_tile = 1
        last_lanes = (row_tile // factor) * (W // factor)
        while (batch_tile < N
               and N % (2 * batch_tile) == 0
               and batch_tile * last_lanes < 128
               and 2 * batch_tile * C * row_tile * W * itemsize <= target):
            batch_tile *= 2
    elif N % batch_tile:
        raise ValueError(f"batch_tile={batch_tile} must divide N={N}")

    return batch_tile, row_tile


def downsample_forward(x_nchw, weights, *, batch_tile=None, row_tile=None):
    """Full DownSample forward, NCHW in / NCHW out (PyTorch convention).

    x_nchw : (N, C, H, W)
    weights: list of (Cout_s, Cin_s) = squeezed PyTorch Conv2d weights (Cout, Cin, 1, 1).
    For bandwidth-bound deployments (especially v5e) pass x/weights as bfloat16: the
    kernel keeps f32 accumulation but HBM/VMEM traffic halves.
    """
    if not weights:                                   # scale_factor == 1 -> identity
        return x_nchw

    N, C, H, W = x_nchw.shape
    n_stages = len(weights)
    factor = 2 ** n_stages
    if H % factor or W % factor:
        # PyTorch's MaxPool2d(2,2) floors odd spatial dims; require even dims at every
        # stage so this kernel matches PyTorch exactly.
        raise ValueError(f"H={H}, W={W} must be divisible by {factor}")
    cin = C
    for wgt in weights:
        if wgt.shape[1] != cin:
            raise ValueError("weight channel chain does not match the input")
        cin = wgt.shape[0]
    c_out = weights[-1].shape[0]
    h_out, w_out = H // factor, W // factor

    vmem_limit = _vmem_limit_bytes()
    nb, ht = _choose_tiles(N, C, H, W, n_stages, x_nchw.dtype.itemsize, vmem_limit,
                           batch_tile, row_tile)
    sign = _roll_sign()

    grid = (N // nb, H // ht)
    hw_blk_out = (ht // factor) * w_out

    in_specs = [pl.BlockSpec((nb, C, ht * W), lambda bi, ti: (bi, 0, ti))]
    in_specs += [pl.BlockSpec(wgt.shape, lambda bi, ti: (0, 0)) for wgt in weights]
    out_specs = pl.BlockSpec((nb, c_out, hw_blk_out), lambda bi, ti: (bi, 0, ti))
    # TODO(synk): sweep pipeline_mode=pl.Buffered(3) on the input spec if xprof shows the
    # input DMA still exposed at large shapes.

    itemsize = x_nchw.dtype.itemsize
    flops, c_s, pix = 0, C, N * H * W
    for wgt in weights:
        flops += 3 * c_s * pix                                    # pooling maxes/selects
        pix //= 4
        flops += 2 * int(wgt.shape[0]) * int(wgt.shape[1]) * pix  # 1x1 conv
        c_s = wgt.shape[0]
    bytes_accessed = (x_nchw.size + N * c_out * h_out * w_out) * itemsize
    bytes_accessed += sum(int(wgt.size) * wgt.dtype.itemsize for wgt in weights)

    out = pl.pallas_call(
        functools.partial(_downsample_kernel, w0=W, roll_sign=sign),
        out_shape=jax.ShapeDtypeStruct((N, c_out, h_out * w_out), x_nchw.dtype),
        grid=grid,
        in_specs=in_specs,
        out_specs=out_specs,
        compiler_params=pltpu.CompilerParams(
            dimension_semantics=("parallel", "parallel"),
            vmem_limit_bytes=int(vmem_limit),
        ),
        cost_estimate=pl.CostEstimate(flops=int(flops), transcendentals=0,
                                      bytes_accessed=int(bytes_accessed)),
    )(x_nchw.reshape(N, C, H * W), *weights)

    return out.reshape(N, c_out, h_out, w_out)


def make_downsample_params(in_channels, scale_factor, key, stride=2):
    """Weights per stage: Conv2d(C, stride*C, 1, bias=False), stored as (Cout, Cin)
    (PyTorch's (Cout, Cin, 1, 1) squeezed), PyTorch default U(-1/sqrt(fan_in), ...)."""
    n_stages = int(np.log2(scale_factor))
    weights = []
    c = in_channels
    for _ in range(n_stages):
        key, sub = jax.random.split(key)
        cout = int(c * stride)
        bound = 1.0 / np.sqrt(c)                      # fan_in = Cin * 1 * 1
        weights.append(jax.random.uniform(sub, (cout, c), jnp.float32,
                                          minval=-bound, maxval=bound))
        c = cout
    return weights


def _reference(x, weights):
    """Pure-JAX reference: exact max-pool + full-precision 1x1 conv, NCHW."""
    ref = x
    for wgt in weights:
        n_, c_, h_, w_ = ref.shape
        ref = jnp.max(ref.reshape(n_, c_, h_ // 2, 2, w_ // 2, 2), axis=(3, 5))
        ref = jnp.einsum("oc,nchw->nohw", wgt, ref,
                         precision=jax.lax.Precision.HIGHEST)
    return ref


if __name__ == "__main__":
    root = jax.random.PRNGKey(0)
    root, xk, wk = jax.random.split(root, 3)

    # Case 1: module-consistent toy shapes: batch=2, in_channels=4, spatial=16,
    # scale_factor=4 -> 2 fused stages: (2,4,16,16) -> (2,8,8,8) -> (2,16,4,4).
    N, C, H, W = 2, 4, 16, 16
    scale_factor = 4
    x = jax.random.normal(xk, (N, C, H, W), dtype=jnp.float32)
    weights = make_downsample_params(C, scale_factor, wk)
    out = jax.block_until_ready(downsample_forward(x, weights))
    assert out.shape == (N, C * scale_factor, H // scale_factor, W // scale_factor)
    np.testing.assert_allclose(np.asarray(out), np.asarray(_reference(x, weights)),
                               rtol=1e-4, atol=1e-4)

    # Case 2: larger spatial extent with forced batch/row tiling so the multi-step
    # double-buffered grid, the single-image path and the chunked decimation path run.
    root, xk2, wk2 = jax.random.split(root, 3)
    x2 = jax.random.normal(xk2, (2, 4, 64, 64), dtype=jnp.float32)
    weights2 = make_downsample_params(4, 4, wk2)
    out2 = jax.block_until_ready(
        downsample_forward(x2, weights2, batch_tile=1, row_tile=32))
    np.testing.assert_allclose(np.asarray(out2), np.asarray(_reference(x2, weights2)),
                               rtol=1e-4, atol=1e-4)

    print("KERNEL_OK")
</pallas_src>

<mosaic_0001>
module attributes {stable_mosaic.version = 11 : i64} {
  func.func @probe(%arg0: memref<8x128xf32, #tpu.memory_space<vmem>>, %arg1: memref<8x128xf32, #tpu.memory_space<vmem>>) attributes {dimension_semantics = [], scalar_prefetch = 0 : i64, scratch_operands = 0 : i64, tpu.core_type = #tpu.core_type<tc>} {
    %c0 = arith.constant 0 : index
    %c0_0 = arith.constant 0 : index
    %0 = vector.load %arg0[%c0, %c0_0] : memref<8x128xf32, #tpu.memory_space<vmem>>, vector<8x128xf32>
    %c1_i32 = arith.constant 1 : i32
    %1 = tpu.dynamic_rotate %0 by %c1_i32 dim 1 : vector<8x128xf32>, i32 -> vector<8x128xf32>
    %c0_1 = arith.constant 0 : index
    %c0_2 = arith.constant 0 : index
    %2 = vector.load %arg1[%c0_1, %c0_2] : memref<8x128xf32, #tpu.memory_space<vmem>>, vector<8x128xf32>
    tpu.vector_store %arg1[%c0_1, %c0_2], %1 {strides = array<i32>} : memref<8x128xf32, #tpu.memory_space<vmem>>, vector<8x128xf32>,
    return
  }
}

</mosaic_0001>

<bundles_post_ra>
// kernel: tpu_custom_call.1
= control target key start
LH: loop header
LB: loop body
LE: loop exit
PB: predicated region body
PF: predicated region fallthrough
CT: control target
= control target key end

     0   :  { %6 = vsyncpa [#allocation3], 0  ;;  %s118_s0 = inlined_call_operand.hbm [shape: f32[8,128], index: 0, kind: input, shape index: {}]   ;;  %s119_s1 = inlined_call_operand.hbm [shape: f32[8,128], index: 1, kind: output, shape index: {}]  }
   0x1   :  { %7 = vsyncpa [#allocation4], 0  ;;  %s13_s8 = sshll.u32 %s118_s0, 4  ;;  %s99_s9 = smov [#allocation2]   ;;  %s14_s8 = int_to_ptr.hbm [resolvable:$true] %s13_s8 }
   0x2   :  { %s15_s10 = sshll.u32 %s99_s9, 4  ;;  %s16_s10 = int_to_ptr.vmem [resolvable:$true] %s15_s10 }
   0x3   :  { %18 = dma.hbm_to_vmem [thread:$0]  %s14_s8, 128, %s16_s10, [#allocation3]  }
   0x4   :  { %95 = dma.done.wait [#allocation3], 128  }
   0x5   :  { %96 = vsyncadd [#allocation3], 4294967168  ;;  %v23_v0 = vld [vmem:[#allocation2] sm:$0xff]  ;;  %s100_s11 = smov 1   ;;  %s101_s12 = smov [#allocation5]  }
   0x6   :  { %24 = vrot.lane.b32.xlu0 %v23_v0, %s100_s11  ;;  %s32_s13 = sshll.u32 %s101_s12, 4  ;;  %s34_s16 = sshll.u32 %s119_s1, 4  ;;  %s33_s13 = int_to_ptr.vmem [resolvable:$true] %s32_s13  ;;  %s35_s16 = int_to_ptr.hbm [resolvable:$true] %s34_s16 }
  0x78   :  { %v25_v1 = vpop.permute.xlu0 %24 }
  0x79   :  { %26 = vst [vmem:[#allocation5] sm:$0xff] %v25_v1 }
  0x7a   :  { %37 = dma.vmem_to_hbm [thread:$0]  %s33_s13, 128, %s35_s16, [#allocation4]  }
  0x7b   :  { %97 = dma.done.wait [#allocation4], 128  }
  0x7c   :  { %98 = vsyncadd [#allocation4], 4294967168 }
  0x7d   :  { %42 = vsyncpa [#allocation3], 1 }
  0x7e   :  { %43 = vsyncpa [#allocation4], 1 }

</bundles_post_ra>
